<compile_context>
chip_gen: v5e
topology: v5e:2x2
jax: 0.10.0
libtpu: 0.0.40
codegen_flags: <defaults>
</compile_context>

<pallas_src>
import math

import jax
import jax.numpy as jnp
from jax.experimental import pallas as pl
from jax.experimental.pallas import tpu as pltpu


def _pos_kernel(tab_ref, o_ref):
    """tab_ref[0]=phase step per grid index, tab_ref[1]=phase at grid index 0.

    Works for both the 3-D dense path (tab (2,TS,128), out (B,TS,128)) and the
    2-D fallback path (tab (2,TF), out (B,TF)).
    """
    off = pl.program_id(0).astype(jnp.float32)      # tile index along N
    step = tab_ref[0:1]                             # (1, ...)  per-element phase increment
    base = tab_ref[1:2]                             # (1, ...)  phase at tile 0 (incl. +pi/2 for odd ch)
    row = jnp.sin(off * step + base)                # 1 mul + 1 add (VPU) + 1 sin (EUP) per element
    # Embedding is identical for every batch element: compute once, broadcast at the store.
    o_ref[...] = jnp.broadcast_to(row, o_ref.shape)


def _choose_ts(b, c, f128, budget_bytes):
    """Sublane tiles per block (dense path): multiple of 8 AND row-aligned."""
    step = math.lcm(8, c // math.gcd(c, 128))       # 8-sublane aligned + whole rows per tile
    bytes_per_sub = 4 * 128 * (2 * b + 4)           # dbl-buffered out block + dbl-buffered 2-row table
    ts = (max(budget_bytes // bytes_per_sub, 1) // step) * step
    if ts <= 0:
        ts = step
    return min(ts, f128)                            # full extent is always a legal block


def _choose_rows(b, n, c, budget_bytes):
    """Rows per block (fallback path): rows*c % 128 == 0, VMEM bounded."""
    step = 128 // math.gcd(c, 128)                  # smallest row count making rows*c lane-dense
    bytes_per_flat = 4 * (2 * b + 4)
    max_rows = (max(budget_bytes // bytes_per_flat, 1)) // c
    tn = (max_rows // step) * step
    if tn <= 0:
        tn = step
    return min(tn, n)


def position_embedding_sine(shape, temperature=10000, scale=None,
                            vmem_budget_bytes=8 << 20):
    """Pallas equivalent of PositionEmbeddingSine.forward(shape, device) -> (B, N, C) f32."""
    b, n, c = (int(d) for d in shape)
    if scale is None:
        scale = 2.0 * math.pi
    # TODO(synk): `temperature` is unused because the PyTorch reference hard-codes 10000 in dim_t.

    # Tiny per-channel constants built once in plain JAX (O(C) work, << B*N*C output bytes).
    ch = jnp.arange(c, dtype=jnp.float32)
    dim_t = 1.0 / (10000.0 ** (2.0 * jnp.floor(ch / 2.0) / c))
    omega = dim_t * (float(scale) / n)                                   # angle per row index, per channel
    phase = jnp.where((jnp.arange(c) % 2) == 0, 0.0, math.pi / 2.0).astype(jnp.float32)

    def build_table(t, rows_per_step):
        """(2, t): [phase increment per grid step, phase within the first tile]."""
        l = jnp.arange(t)
        chl = l % c
        step_tab = omega[chl] * float(rows_per_step)
        base_tab = (l // c).astype(jnp.float32) * omega[chl] + phase[chl]
        return jnp.stack([step_tab, base_tab])                           # (2, t) f32

    flat = n * c
    params = pltpu.CompilerParams(dimension_semantics=("parallel",))

    if flat % 128 == 0:
        # Dense path: output viewed as (B, flat/128, 128); blocks fully packed (8,128) vregs.
        f128 = flat // 128
        ts = _choose_ts(b, c, f128, vmem_budget_bytes)
        t = ts * 128                                                     # flat elements per tile
        rows_per_tile = t // c                                           # tiles cover whole rows
        table = build_table(t, rows_per_tile).reshape(2, ts, 128)
        grid = pl.cdiv(f128, ts)
        out_flat = pl.pallas_call(
            _pos_kernel,
            out_shape=jax.ShapeDtypeStruct((b, f128, 128), jnp.float32),
            grid=(grid,),
            in_specs=[pl.BlockSpec((2, ts, 128), lambda i: (0, 0, 0))],  # same block every step
            out_specs=pl.BlockSpec((b, ts, 128), lambda i: (0, i, 0)),   # sublane+lane dense stores
            compiler_params=params,
            cost_estimate=pl.CostEstimate(
                flops=2 * grid * t,
                transcendentals=grid * t,
                bytes_accessed=4 * (b * flat + 2 * t)),
        )(table)
    else:
        # Fallback: lane-dense flattened 2-D tiles (TN*C multiple of 128, or full extent).
        tn = _choose_rows(b, n, c, vmem_budget_bytes)
        t = tn * c
        table = build_table(t, tn)                                       # (2, t)
        grid = pl.cdiv(n, tn)
        out_flat = pl.pallas_call(
            _pos_kernel,
            out_shape=jax.ShapeDtypeStruct((b, flat), jnp.float32),
            grid=(grid,),
            in_specs=[pl.BlockSpec((2, t), lambda i: (0, 0))],
            out_specs=pl.BlockSpec((b, t), lambda i: (0, i)),
            compiler_params=params,
            cost_estimate=pl.CostEstimate(
                flops=2 * grid * t,
                transcendentals=grid * t,
                bytes_accessed=4 * (b * flat + 2 * t)),
        )(table)

    return out_flat.reshape(b, n, c)


def _reference(shape, temperature=10000, scale=None):
    """Plain-JAX transcription of the PyTorch forward semantics."""
    b, n, c = shape
    if scale is None:
        scale = 2.0 * math.pi
    dim_t = jnp.arange(c, dtype=jnp.float32)
    dim_t = 1.0 / (10000.0 ** (2.0 * jnp.floor(dim_t / 2.0) / c))
    pos = jnp.arange(n, dtype=jnp.float32) / n * scale
    pos = jnp.broadcast_to(pos[None, :, None], (b, n, c)) * dim_t
    even = (jnp.arange(c) % 2) == 0
    return jnp.where(even[None, None, :], jnp.sin(pos), jnp.cos(pos))


if __name__ == "__main__":
    # Module has no tensor inputs or learned parameters; key only for protocol.
    _ = jax.random.PRNGKey(0)

    # (batch=2, seq=8, channels=32): N*C % 128 == 0 -> dense path, single tile.
    shape = (2, 8, 32)
    out = jax.block_until_ready(position_embedding_sine(shape))
    ref = _reference(shape)
    assert out.shape == shape and out.dtype == jnp.float32
    assert jnp.allclose(out, ref, atol=1e-5, rtol=1e-5), "mismatch vs reference (2,8,32)"

    # Multi-tile dense path (forced tiny VMEM budget -> several (B,8,128) blocks).
    shape2 = (2, 96, 32)
    out2 = jax.block_until_ready(
        position_embedding_sine(shape2, vmem_budget_bytes=16 << 10))
    assert jnp.allclose(out2, _reference(shape2), atol=1e-5, rtol=1e-5), \
        "mismatch vs reference (2,96,32)"

    # Dense path with C not dividing 128 (row-aligned lcm tile = 24 sublanes).
    shape4 = (2, 64, 96)
    out4 = jax.block_until_ready(
        position_embedding_sine(shape4, vmem_budget_bytes=64 << 10))
    assert jnp.allclose(out4, _reference(shape4), atol=1e-5, rtol=1e-5), \
        "mismatch vs reference (2,64,96)"

    # N*C not a multiple of 128 -> 2-D fallback; last (partial) block masked on store.
    shape3 = (2, 50, 32)
    out3 = jax.block_until_ready(
        position_embedding_sine(shape3, vmem_budget_bytes=16 << 10))
    assert jnp.allclose(out3, _reference(shape3), atol=1e-5, rtol=1e-5), \
        "mismatch vs reference (2,50,32)"

    print("KERNEL_OK")
</pallas_src>

<mosaic_0001>
module attributes {stable_mosaic.version = 11 : i64} {
  func.func @_pos_kernel(%arg0: i32, %arg1: memref<2x2x128xf32, #tpu.memory_space<vmem>>, %arg2: memref<2x2x128xf32, #tpu.memory_space<vmem>>) attributes {dimension_semantics = [#tpu.dimension_semantics<parallel>], iteration_bounds = array<i64: 1>, scalar_prefetch = 0 : i64, scratch_operands = 0 : i64, tpu.core_type = #tpu.core_type<tc>, window_params = [{pipeline_mode = #tpu.pipeline_mode<synchronous>, transform_indices = @transform_0, window_bounds = array<i64: 2, 2, 128>}, {transform_indices = @transform_1, window_bounds = array<i64: 2, 2, 128>}]} {
    %0 = arith.sitofp %arg0 : i32 to f32
    %c0 = arith.constant 0 : index
    %c0_0 = arith.constant 0 : index
    %c0_1 = arith.constant 0 : index
    %1 = vector.load %arg1[%c0, %c0_0, %c0_1] : memref<2x2x128xf32, #tpu.memory_space<vmem>>, vector<1x2x128xf32>
    %c1 = arith.constant 1 : index
    %c0_2 = arith.constant 0 : index
    %c0_3 = arith.constant 0 : index
    %2 = vector.load %arg1[%c1, %c0_2, %c0_3] : memref<2x2x128xf32, #tpu.memory_space<vmem>>, vector<1x2x128xf32>
    %3 = vector.broadcast %0 : f32 to vector<1x2x128xf32>
    %4 = arith.mulf %3, %1 : vector<1x2x128xf32>
    %5 = arith.addf %4, %2 : vector<1x2x128xf32>
    %6 = math.sin %5 : vector<1x2x128xf32>
    %7 = vector.shape_cast %6 : vector<1x2x128xf32> to vector<1x2x128xf32>
    %8 = vector.broadcast %7 : vector<1x2x128xf32> to vector<2x2x128xf32>
    %c0_4 = arith.constant 0 : index
    %c0_5 = arith.constant 0 : index
    %c0_6 = arith.constant 0 : index
    %9 = vector.load %arg2[%c0_4, %c0_5, %c0_6] : memref<2x2x128xf32, #tpu.memory_space<vmem>>, vector<2x2x128xf32>
    tpu.vector_store %arg2[%c0_4, %c0_5, %c0_6], %8 {strides = array<i32>} : memref<2x2x128xf32, #tpu.memory_space<vmem>>, vector<2x2x128xf32>,
    return
  }
  func.func @transform_0(%arg0: i32) -> (i32, i32, i32) {
    %c0_i32 = arith.constant 0 : i32
    %c0_i32_0 = arith.constant 0 : i32
    %c0_i32_1 = arith.constant 0 : i32
    %c0_i32_2 = arith.constant 0 : i32
    return %c0_i32, %c0_i32_0, %c0_i32_1 : i32, i32, i32
  }
  func.func @transform_1(%arg0: i32) -> (i32, i32, i32) {
    %c0_i32 = arith.constant 0 : i32
    %c0_i32_0 = arith.constant 0 : i32
    %c0_i32_1 = arith.constant 0 : i32
    return %c0_i32, %arg0, %c0_i32_0 : i32, i32, i32
  }
}

</mosaic_0001>

<bundles_post_ra>
// kernel: tpu_custom_call.1
= control target key start
LH: loop header
LB: loop body
LE: loop exit
PB: predicated region body
PF: predicated region fallthrough
CT: control target
= control target key end

     0   :  { %6 = vsyncpa [#allocation3], 0  ;;  %s353_s0 = inlined_call_operand.hbm [shape: f32[2,2,128], index: 0, kind: input, shape index: {}]   ;;  %s354_s1 = inlined_call_operand.hbm [shape: f32[2,2,128], index: 1, kind: output, shape index: {}]  }
   0x1   :  { %7 = vsyncpa [#allocation4], 0  ;;  %s12_s8 = sshll.u32 %s353_s0, 4  ;;  %s274_s9 = smov [#allocation2]   ;;  %s13_s8 = int_to_ptr.hbm [resolvable:$true] %s12_s8 }
   0x2   :  { %s14_s10 = sshll.u32 %s274_s9, 4  ;;  %s275_s11 = smov 32   ;;  %s15_s10 = int_to_ptr.vmem [resolvable:$true] %s14_s10 }
   0x3   :  { %s276_s12 = smov 2  }
   0x4   :  { %20 = dma.hbm_to_vmem [thread:$0]  %s13_s8, 64, %s15_s10, [#allocation3], %s275_s11, %s275_s11, %s276_s12  }
   0x5   :  { %270 = dma.done.wait [#allocation3], 64  }
   0x6   :  { %271 = vsyncadd [#allocation3], 4294967232  ;;  %v26_v0 = vld [vmem:[#allocation2] sm:$0x3]  ;;  %v28_v1 = vld [vmem:[#allocation2 + $0x2] sm:$0x3] }
   0x7   :  { %v30_v2 = vmul.f32 0.0, %v26_v0  ;;  %v277_v15 = vmov 683565275   ;;  %v278_v17 = vmov 2475754826   ;;  %s284_s0 = smov [#allocation5]  }
   0x8   :  { %v279_v19 = vmov 2131351028   ;;  %v280_v21 = vmov 2102212464   ;;  %v281_v23 = vmov 920167782  }
   0x9   :  { %v301_v3 = vadd.f32 %v30_v2, %v28_v1  ;;  %v282_v29 = vmov 1326507024   ;;  %s193_s13 = sshll.u32 %s284_s0, 4  ;;  %s195_s16 = sshll.u32 %s354_s1, 4  ;;  %s194_s13 = int_to_ptr.vmem [resolvable:$true] %s193_s13  ;;  %s196_s16 = int_to_ptr.hbm [resolvable:$true] %s195_s16 }
   0xb   :  { %v35_v4 = vand.u32 2139095040, %v301_v3  ;;  %v32_v6 = vand.u32 2147483647, %v301_v3  ;;  %vm34_vm12 = vcmp.lt.s32.totalorder %v301_v3, 0 }
   0xd   :  { %v36_v5 = vshrl.u32 %v35_v4, 23  ;;  %v39_v9 = vand.u32 8388607, %v32_v6  ;;  %v283_v4 = vmov 0   ;;  %vm33_vm13 = vcmp.le.f32.partialorder %v32_v6, 0.7853982 }
   0xf   :  { %v208_v7 = vadd.s32 4294967169, %v36_v5  ;;  %v40_v12 = vor.u32 8388608, %v39_v9 }
  0x11   :  { %v42_v8 = vadd.s32 1, %v208_v7  ;;  %v310_v31 = vshll.u32 %v40_v12, 8 }
  0x13   :  { %vm43_vm0 = vcmp.gt.s32.totalorder %v42_v8, 0  ;;  %v81_v43 = vand.u32 65535, %v310_v31  ;;  %v82_v44 = vshrl.u32 %v310_v31, 16 }
  0x14   :  { %v44_v10 = vsel %vm43_vm0, %v42_v8, 0 }
  0x15   :  { %v46_v11 = vand.u32 31, %v44_v10  ;;  %v307_v13 = vshrl.u32 %v44_v10, 5 }
  0x17   :  { %v47_v14 = vsub.s32 32, %v46_v11  ;;  %v49_v16 = vshll.u32 %v277_v15, %v46_v11  ;;  %v52_v18 = vshll.u32 %v278_v17, %v46_v11  ;;  %v55_v20 = vshll.u32 %v279_v19, %v46_v11 }
  0x18   :  { %v58_v22 = vshll.u32 %v280_v21, %v46_v11  ;;  %v61_v24 = vshll.u32 %v281_v23, %v46_v11  ;;  %vm64_vm1 = vcmp.lt.s32.totalorder %v307_v13, 1  ;;  %vm67_vm2 = vcmp.lt.s32.totalorder %v307_v13, 4 }
  0x19   :  { %v50_v25 = vshrl.u32 %v278_v17, %v47_v14  ;;  %v53_v26 = vshrl.u32 %v279_v19, %v47_v14  ;;  %v56_v27 = vshrl.u32 %v280_v21, %v47_v14  ;;  %v59_v28 = vshrl.u32 %v281_v23, %v47_v14 }
  0x1a   :  { %v62_v30 = vshrl.u32 %v282_v29, %v47_v14  ;;  %vm66_vm3 = vcmp.lt.s32.totalorder %v307_v13, 3  ;;  %vm65_vm4 = vcmp.lt.s32.totalorder %v307_v13, 2  ;;  %v48_v51 = vshrl.u32 %v277_v15, %v47_v14 }
  0x1b   :  { %v51_v32 = vor.u32 %v50_v25, %v49_v16  ;;  %v54_v33 = vor.u32 %v53_v26, %v52_v18  ;;  %v57_v34 = vor.u32 %v56_v27, %v55_v20  ;;  %v60_v35 = vor.u32 %v59_v28, %v58_v22 }
  0x1c   :  { %v63_v36 = vor.u32 %v62_v30, %v61_v24 }
  0x1d   :  { %v72_v37 = vsel %vm64_vm1, %v51_v32, %v54_v33  ;;  %v76_v38 = vsel %vm64_vm1, %v54_v33, %v57_v34  ;;  %v73_v39 = vsel %vm67_vm2, %v60_v35, 920167782  ;;  %v68_v0 = vsel %vm64_vm1, %v48_v51, %v51_v32 }
  0x1e   :  { %v77_v40 = vsel %vm67_vm2, %v63_v36, 1326507024  ;;  %v74_v41 = vsel %vm66_vm3, %v57_v34, %v73_v39  ;;  %v69_v2 = vsel %vm67_vm2, %v57_v34, 2102212464  ;;  %vm175_vm1 = vweird.f32 %v301_v3 }
  0x1f   :  { %v78_v42 = vsel %vm66_vm3, %v60_v35, %v77_v40  ;;  %v75_v45 = vsel %vm65_vm4, %v72_v37, %v74_v41  ;;  %v70_v15 = vsel %vm66_vm3, %v54_v33, %v69_v2 }
  0x20   :  { %v79_v46 = vsel %vm65_vm4, %v76_v38, %v78_v42  ;;  %v105_v49 = vand.u32 65535, %v75_v45  ;;  %v106_v50 = vshrl.u32 %v75_v45, 16  ;;  %v71_v23 = vsel %vm65_vm4, %v68_v0, %v70_v15 }
  0x21   :  { %v83_v47 = vand.u32 65535, %v79_v46  ;;  %v84_v48 = vshrl.u32 %v79_v46, 16  ;;  %v125_v27 = vmul.u32 %v310_v31, %v71_v23 }
  0x22   :  { %v107_v55 = vmul.u32 %v105_v49, %v81_v43  ;;  %v108_v56 = vmul.u32 %v106_v50, %v81_v43  ;;  %v109_v57 = vmul.u32 %v105_v49, %v82_v44  ;;  %v110_v61 = vmul.u32 %v106_v50, %v82_v44 }
  0x23   :  { %v85_v52 = vmul.u32 %v83_v47, %v81_v43  ;;  %v86_v53 = vmul.u32 %v84_v48, %v81_v43  ;;  %v87_v54 = vmul.u32 %v83_v47, %v82_v44  ;;  %v88_v58 = vmul.u32 %v84_v48, %v82_v44 }
  0x24   :  { %v111_v62 = vshll.u32 %v108_v56, 16  ;;  %v113_v63 = vshll.u32 %v109_v57, 16  ;;  %v112_v12 = vshrl.u32 %v108_v56, 16  ;;  %v114_v19 = vshrl.u32 %v109_v57, 16 }
  0x25   :  { %v89_v59 = vshll.u32 %v86_v53, 16  ;;  %v91_v60 = vshll.u32 %v87_v54, 16  ;;  %v90_v8 = vshrl.u32 %v86_v53, 16  ;;  %v92_v16 = vshrl.u32 %v87_v54, 16 }
  0x26   :  { %vm115_vm6 = vc.u32 %v107_v55, %v111_v62  ;;  %v117_v7 = vadd.s32 %v111_v62, %v107_v55 }
  0x27   :  { %vm93_vm5 = vc.u32 %v85_v52, %v89_v59  ;;  %v95_v1 = vadd.s32 %v89_v59, %v85_v52  ;;  %v116_v10 = vsel %vm115_vm6, 1, %v283_v4 }
  0x28   :  { %v94_v5 = vsel %vm93_vm5, 1, %v283_v4  ;;  %v118_v14 = vadd.s32 %v116_v10, %v110_v61  ;;  %vm119_vm8 = vc.u32 %v117_v7, %v113_v63  ;;  %v121_v22 = vadd.s32 %v117_v7, %v113_v63 }
  0x29   :  { %v96_v9 = vadd.s32 %v94_v5, %v88_v58  ;;  %vm97_vm7 = vc.u32 %v95_v1, %v91_v60  ;;  %v120_v18 = vsel %vm119_vm8, 1, %v283_v4 }
  0x2a   :  { %v98_v11 = vsel %vm97_vm7, 1, %v283_v4  ;;  %v122_v20 = vadd.s32 %v120_v18, %v118_v14 }
  0x2b   :  { %v100_v17 = vadd.s32 %v98_v11, %v96_v9 }
  0x2c   :  { %v123_v24 = vadd.s32 %v122_v20, %v112_v12 }
  0x2d   :  { %v101_v21 = vadd.s32 %v100_v17, %v90_v8 }
  0x2e   :  { %v124_v26 = vadd.s32 %v123_v24, %v114_v19 }
  0x2f   :  { %v102_v25 = vadd.s32 %v101_v21, %v92_v16 }
  0x30   :  { %v128_v28 = vadd.s32 1, %v124_v26 }
  0x31   :  { %vm127_vm9 = vc.u32 %v102_v25, %v121_v22  ;;  %v126_v13 = vadd.s32 %v121_v22, %v102_v25 }
  0x32   :  { %v129_v29 = vsel %vm127_vm9, %v128_v28, %v124_v26 }
  0x33   :  { %v130_v30 = vadd.s32 %v129_v29, %v125_v27 }
  0x35   :  { %v131_v32 = vadd.s32 536870912, %v130_v30 }
  0x37   :  { %v132_v33 = vshrl.u32 %v131_v32, 30 }
  0x39   :  { %v133_v34 = vshll.u32 %v132_v33, 30  ;;  %v156_v51 = vsub.s32 4, %v132_v33 }
  0x3b   :  { %v134_v35 = vsub.s32 %v130_v30, %v133_v34  ;;  %v157_v54 = vsel %vm34_vm12, %v156_v51, %v132_v33 }
  0x3c   :  { %v159_v57 = vsel %vm33_vm13, 0, %v157_v54 }
  0x3d   :  { %vm135_vm10 = vcmp.lt.s32.totalorder %v134_v35, 0  ;;  %v136_v36 = vsub.s32 0, %v134_v35  ;;  %v176_v62 = vadd.s32 3, %v159_v57 }
  0x3f   :  { %v137_v37 = vsel %vm135_vm10, %v136_v36, %v134_v35  ;;  %v177_v4 = vand.u32 3, %v176_v62 }
  0x40   :  { %v138_v38 = vclz %v137_v37 }
  0x41   :  { %vm182_vm14 = vcmp.eq.s32.totalorder %v177_v4, 2  ;;  %vm179_vm15 = vcmp.eq.s32.totalorder %v177_v4, 0  ;;  %vm178_vm0 = vcmp.lt.s32.totalorder %v177_v4, 2 }
  0x42   :  { %v209_v39 = vadd.s32 4294967294, %v138_v38 }
  0x44   :  { %vm210_vm11 = vcmp.lt.s32.totalorder %v209_v39, 0 }
  0x45   :  { %v141_v40 = vsel %vm210_vm11, 0, %v209_v39 }
  0x46   :  { %v142_v41 = vsub.s32 32, %v141_v40  ;;  %v143_v42 = vshll.u32 %v134_v35, %v141_v40  ;;  %v146_v43 = vsub.s32 4294967266, %v141_v40 }
  0x48   :  { %v144_v31 = vshrl.u32 %v126_v13, %v142_v41  ;;  %v147_v44 = vadd.s32 127, %v146_v43 }
  0x4a   :  { %v145_v45 = vor.u32 %v144_v31, %v143_v42  ;;  %v148_v46 = vshll.u32 %v147_v44, 23 }
  0x4c   :  { %v149_v47 = vor.u32 4788187, %v148_v46  ;;  %v152_v48 = vcvt.s32.f32 %v145_v45 }
  0x4e   :  { %v150_v49 = vand.u32 2147483647, %v149_v47 }
  0x50   :  { %v153_v50 = vmul.f32 %v152_v48, %v150_v49 }
  0x52   :  { %v154_v52 = vxor.u32 2147483648, %v153_v50 }
  0x54   :  { %v155_v53 = vsel %vm34_vm12, %v154_v52, %v153_v50 }
  0x55   :  { %v158_v55 = vsel %vm33_vm13, %v301_v3, %v155_v53 }
  0x56   :  { %v160_v56 = vmul.f32 %v158_v55, %v158_v55 }
  0x58   :  { %v161_v58 = vmul.f32 -0.001358992, %v160_v56  ;;  %v168_v59 = vmul.f32 -0.00019511016, %v160_v56 }
  0x5a   :  { %v162_v60 = vadd.f32 0.041655596, %v161_v58  ;;  %v169_v61 = vadd.f32 0.008332121, %v168_v59 }
  0x5c   :  { %v163_v63 = vmul.f32 %v162_v60, %v160_v56  ;;  %v170_v0 = vmul.f32 %v169_v61, %v160_v56 }
  0x5e   :  { %v164_v1 = vadd.f32 -0.4999988, %v163_v63  ;;  %v171_v2 = vadd.f32 -0.16666654, %v170_v0 }
  0x60   :  { %v165_v5 = vmul.f32 %v164_v1, %v160_v56  ;;  %v172_v7 = vmul.f32 %v171_v2, %v160_v56 }
  0x62   :  { %v166_v6 = vadd.f32 1.0, %v165_v5  ;;  %v173_v8 = vadd.f32 1.0, %v172_v7 }
  0x64   :  { %v174_v9 = vmul.f32 %v173_v8, %v158_v55  ;;  %v183_v10 = vxor.u32 2147483648, %v166_v6 }
  0x66   :  { %v180_v11 = vxor.u32 2147483648, %v174_v9  ;;  %v184_v12 = vsel %vm182_vm14, %v183_v10, %v174_v9 }
  0x68   :  { %v181_v14 = vsel %vm179_vm15, %v166_v6, %v180_v11 }
  0x69   :  { %v185_v15 = vsel %vm178_vm0, %v181_v14, %v184_v12 }
  0x6a   :  { %v186_v16 = vsel %vm175_vm1, nan, %v185_v15 }
  0x6b   :  { %187 = vst [vmem:[#allocation5] sm:$0x3] %v186_v16 }
  0x6c   :  { %188 = vst [vmem:[#allocation5 + $0x2] sm:$0x3] %v186_v16 }
  0x6d   :  { %201 = dma.vmem_to_hbm [thread:$0]  %s194_s13, 64, %s196_s16, [#allocation4], %s275_s11, %s275_s11, %s276_s12  }
  0x6e   :  { %272 = dma.done.wait [#allocation4], 64  }
  0x6f   :  { %273 = vsyncadd [#allocation4], 4294967232 }
  0x70   :  { %206 = vsyncpa [#allocation3], 1 }
  0x71   :  { %207 = vsyncpa [#allocation4], 1 }

</bundles_post_ra>
